<compile_context>
chip_gen: v5e
topology: v5e:2x2
jax: 0.10.0
libtpu: 0.0.40
codegen_flags: <defaults>
</compile_context>

<pallas_src>
import jax
import jax.numpy as jnp
import numpy as np
from jax.experimental import pallas as pl
from jax.experimental.pallas import tpu as pltpu

HIDDEN = 150        # fixed by the module
HIDDEN_PAD = 256    # power-of-two padded hidden width (zero-padded)
LANE = 128


def _round_up(n, m):
    return (n + m - 1) // m * m


def rasmus_mlp_kernel(x_ref, w1_ref, b1_ref, w2_ref, b2_ref, w3_ref, b3_ref,
                      o_ref):
    """One batch tile of the full MLP, entirely in VMEM.

    x_ref : (TB, D_in)                     bf16 (or f32)
    w1    : (D_in, Hp)   b1: (1, Hp)       Hp = 256 (zero-padded)
    w2    : (Hp, Hp)     b2: (1, Hp)
    w3    : (Hp, Dp)     b3: (1, Dp)       Dp = 128*k (zero-padded)
    o_ref : (TB, Dp)                       f32, lane-dense store
    """
    x = x_ref[...]
    # Layer 1: MXU matmul (bf16 operands), f32 accumulate / bias / tanh.
    h1 = jnp.tanh(
        jnp.dot(x, w1_ref[...], preferred_element_type=jnp.float32)
        + b1_ref[...])
    # Layer 2.
    h2 = jnp.tanh(
        jnp.dot(h1.astype(w2_ref.dtype), w2_ref[...],
                preferred_element_type=jnp.float32)
        + b2_ref[...])
    # Layer 3 + sigmoid on a 128-wide (lane-dense) output tile.
    logits = (jnp.dot(h2.astype(w3_ref.dtype), w3_ref[...],
                      preferred_element_type=jnp.float32)
              + b3_ref[...])
    o_ref[...] = jax.nn.sigmoid(logits).astype(o_ref.dtype)


def rasmus_forward(x, params, *, max_tb=1024, compute_dtype=jnp.bfloat16):
    """Pallas forward pass. x: (B, d_in) f32. Returns (B, d_out) f32."""
    w1, b1, w2, b2, w3, b3 = params
    B, d_in = x.shape
    d_out = w3.shape[1]
    d_out_pad = _round_up(d_out, LANE)

    # ---- wrapper-side padding (layout plumbing, exact zero padding) --------
    w1p = jnp.zeros((d_in, HIDDEN_PAD), compute_dtype).at[:, :HIDDEN].set(
        w1.astype(compute_dtype))
    b1p = jnp.zeros((1, HIDDEN_PAD), jnp.float32).at[:, :HIDDEN].set(b1)
    w2p = jnp.zeros((HIDDEN_PAD, HIDDEN_PAD), compute_dtype).at[
        :HIDDEN, :HIDDEN].set(w2.astype(compute_dtype))
    b2p = jnp.zeros((1, HIDDEN_PAD), jnp.float32).at[:, :HIDDEN].set(b2)
    w3p = jnp.zeros((HIDDEN_PAD, d_out_pad), compute_dtype).at[
        :HIDDEN, :d_out].set(w3.astype(compute_dtype))
    b3p = jnp.zeros((1, d_out_pad), jnp.float32).at[:, :d_out].set(b3)

    # ---- batch tiling: one big tile for small B, <=max_tb rows per step ----
    # (max_tb=1024: x tile + f32 h1/h2 + 128-wide f32 output tile stay well
    #  under v7x's 32 MiB default scoped VMEM; weights are ~400 KB total.)
    tb = min(max_tb, _round_up(B, 16))
    B_pad = _round_up(B, tb)
    xp = x.astype(compute_dtype)
    if B_pad != B:
        xp = jnp.zeros((B_pad, d_in), compute_dtype).at[:B].set(xp)

    grid = (B_pad // tb,)
    full = lambda a: pl.BlockSpec(a.shape, lambda i: (0, 0))

    cost = pl.CostEstimate(
        flops=2 * B_pad * (d_in * HIDDEN_PAD + HIDDEN_PAD * HIDDEN_PAD
                           + HIDDEN_PAD * d_out_pad),
        transcendentals=B_pad * (2 * HIDDEN_PAD + d_out_pad),
        bytes_accessed=(xp.size * xp.dtype.itemsize
                        + sum(a.size * a.dtype.itemsize
                              for a in (w1p, b1p, w2p, b2p, w3p, b3p))
                        + B_pad * d_out_pad * 4),
    )

    out_padded = pl.pallas_call(
        rasmus_mlp_kernel,
        out_shape=jax.ShapeDtypeStruct((B_pad, d_out_pad), jnp.float32),
        grid_spec=pltpu.PrefetchScalarGridSpec(
            num_scalar_prefetch=0,
            grid=grid,
            in_specs=[
                pl.BlockSpec((tb, d_in), lambda i: (i, 0)),
                full(w1p), full(b1p),
                full(w2p), full(b2p),
                full(w3p), full(b3p),
            ],
            out_specs=pl.BlockSpec((tb, d_out_pad), lambda i: (i, 0)),
        ),
        compiler_params=pltpu.CompilerParams(
            dimension_semantics=("parallel",)),
        cost_estimate=cost,
    )(xp, w1p, b1p, w2p, b2p, w3p, b3p)

    # Strip batch padding and the lane-padding of the output.
    return out_padded[:B, :d_out]


def init_params(key, input_dim, output_dim, hidden_dim=HIDDEN):
    """Deterministic init mimicking nn.Linear's U(-1/sqrt(fan_in), +...)."""
    keys = jax.random.split(key, 6)

    def linear(kw, kb, fan_in, fan_out):
        bound = 1.0 / np.sqrt(fan_in)
        w = jax.random.uniform(kw, (fan_in, fan_out), jnp.float32,
                               -bound, bound)
        b = jax.random.uniform(kb, (1, fan_out), jnp.float32, -bound, bound)
        return w, b

    w1, b1 = linear(keys[0], keys[1], input_dim, hidden_dim)
    w2, b2 = linear(keys[2], keys[3], hidden_dim, hidden_dim)
    w3, b3 = linear(keys[4], keys[5], hidden_dim, output_dim)
    return (w1, b1, w2, b2, w3, b3)


def reference_forward(x, params):
    """Plain-JAX f32 reference of the PyTorch forward pass."""
    w1, b1, w2, b2, w3, b3 = params
    h1 = jnp.tanh(x @ w1 + b1)
    h2 = jnp.tanh(h1 @ w2 + b2)
    return jax.nn.sigmoid(h2 @ w3 + b3)


if __name__ == "__main__":
    key = jax.random.PRNGKey(0)
    k_x1, k_x2, k_p = jax.random.split(key, 3)

    # Small shapes consistent with the module: hidden=150 fixed; pick
    # input_dim=32, output_dim=4.
    D_IN, D_OUT = 32, 4
    params = init_params(k_p, D_IN, D_OUT)

    # Case 1: small batch, default bf16 MXU-operand path (single grid step).
    x1 = jax.random.normal(k_x1, (16, D_IN), dtype=jnp.float32)
    out1 = jax.block_until_ready(rasmus_forward(x1, params))
    ref1 = reference_forward(x1, params)
    assert out1.shape == (16, D_OUT)
    assert jnp.allclose(out1, ref1, atol=2.5e-2), "bf16 kernel mismatch"

    # Case 2: ragged batch (exercises pad-and-slice), f32 compute path checked
    # at tight tolerance to validate the kernel structure itself.
    x2 = jax.random.normal(k_x2, (13, D_IN), dtype=jnp.float32)
    out2 = jax.block_until_ready(
        rasmus_forward(x2, params, compute_dtype=jnp.float32))
    ref2 = reference_forward(x2, params)
    assert out2.shape == (13, D_OUT)
    assert jnp.allclose(out2, ref2, atol=1e-4, rtol=1e-4), "f32 kernel mismatch"

    print("KERNEL_OK")
</pallas_src>

<mosaic_0001>
module attributes {stable_mosaic.version = 11 : i64} {
  func.func @rasmus_mlp_kernel(%arg0: i32, %arg1: memref<16x32xbf16, #tpu.memory_space<vmem>>, %arg2: memref<32x256xbf16, #tpu.memory_space<vmem>>, %arg3: memref<1x256xf32, #tpu.memory_space<vmem>>, %arg4: memref<256x256xbf16, #tpu.memory_space<vmem>>, %arg5: memref<1x256xf32, #tpu.memory_space<vmem>>, %arg6: memref<256x128xbf16, #tpu.memory_space<vmem>>, %arg7: memref<1x128xf32, #tpu.memory_space<vmem>>, %arg8: memref<16x128xf32, #tpu.memory_space<vmem>>) attributes {dimension_semantics = [#tpu.dimension_semantics<parallel>], iteration_bounds = array<i64: 1>, scalar_prefetch = 0 : i64, scratch_operands = 0 : i64, tpu.core_type = #tpu.core_type<tc>, window_params = [{transform_indices = @transform_0, window_bounds = array<i64: 16, 32>}, {pipeline_mode = #tpu.pipeline_mode<synchronous>, transform_indices = @transform_1, window_bounds = array<i64: 32, 256>}, {pipeline_mode = #tpu.pipeline_mode<synchronous>, transform_indices = @transform_2, window_bounds = array<i64: 1, 256>}, {pipeline_mode = #tpu.pipeline_mode<synchronous>, transform_indices = @transform_3, window_bounds = array<i64: 256, 256>}, {pipeline_mode = #tpu.pipeline_mode<synchronous>, transform_indices = @transform_4, window_bounds = array<i64: 1, 256>}, {pipeline_mode = #tpu.pipeline_mode<synchronous>, transform_indices = @transform_5, window_bounds = array<i64: 256, 128>}, {pipeline_mode = #tpu.pipeline_mode<synchronous>, transform_indices = @transform_6, window_bounds = array<i64: 1, 128>}, {transform_indices = @transform_7, window_bounds = array<i64: 16, 128>}]} {
    %c0 = arith.constant 0 : index
    %c0_0 = arith.constant 0 : index
    %0 = vector.load %arg1[%c0, %c0_0] : memref<16x32xbf16, #tpu.memory_space<vmem>>, vector<16x32xbf16>
    %c0_1 = arith.constant 0 : index
    %c0_2 = arith.constant 0 : index
    %1 = vector.load %arg2[%c0_1, %c0_2] : memref<32x256xbf16, #tpu.memory_space<vmem>>, vector<32x256xbf16>
    %cst = arith.constant dense<0.000000e+00> : vector<16x256xf32>
    %2 = tpu.matmul %0, %1, %cst {dimension_numbers = #tpu.dot_dimension_numbers<[1], [0], [0], [1], [0, 0, 1, 1], [], []>} : vector<16x32xbf16>, vector<32x256xbf16>, vector<16x256xf32> -> vector<16x256xf32>
    %c0_3 = arith.constant 0 : index
    %c0_4 = arith.constant 0 : index
    %3 = vector.load %arg3[%c0_3, %c0_4] : memref<1x256xf32, #tpu.memory_space<vmem>>, vector<1x256xf32>
    %4 = vector.broadcast %3 : vector<1x256xf32> to vector<16x256xf32>
    %5 = arith.addf %2, %4 : vector<16x256xf32>
    %6 = math.tanh %5 : vector<16x256xf32>
    %7 = arith.truncf %6 : vector<16x256xf32> to vector<16x256xbf16>
    %c0_5 = arith.constant 0 : index
    %c0_6 = arith.constant 0 : index
    %8 = vector.load %arg4[%c0_5, %c0_6] : memref<256x256xbf16, #tpu.memory_space<vmem>>, vector<256x256xbf16>
    %cst_7 = arith.constant dense<0.000000e+00> : vector<16x256xf32>
    %9 = tpu.matmul %7, %8, %cst_7 {dimension_numbers = #tpu.dot_dimension_numbers<[1], [0], [0], [1], [0, 0, 1, 1], [], []>} : vector<16x256xbf16>, vector<256x256xbf16>, vector<16x256xf32> -> vector<16x256xf32>
    %c0_8 = arith.constant 0 : index
    %c0_9 = arith.constant 0 : index
    %10 = vector.load %arg5[%c0_8, %c0_9] : memref<1x256xf32, #tpu.memory_space<vmem>>, vector<1x256xf32>
    %11 = vector.broadcast %10 : vector<1x256xf32> to vector<16x256xf32>
    %12 = arith.addf %9, %11 : vector<16x256xf32>
    %13 = math.tanh %12 : vector<16x256xf32>
    %14 = arith.truncf %13 : vector<16x256xf32> to vector<16x256xbf16>
    %c0_10 = arith.constant 0 : index
    %c0_11 = arith.constant 0 : index
    %15 = vector.load %arg6[%c0_10, %c0_11] : memref<256x128xbf16, #tpu.memory_space<vmem>>, vector<256x128xbf16>
    %cst_12 = arith.constant dense<0.000000e+00> : vector<16x128xf32>
    %16 = tpu.matmul %14, %15, %cst_12 {dimension_numbers = #tpu.dot_dimension_numbers<[1], [0], [0], [1], [0, 0, 1, 1], [], []>} : vector<16x256xbf16>, vector<256x128xbf16>, vector<16x128xf32> -> vector<16x128xf32>
    %c0_13 = arith.constant 0 : index
    %c0_14 = arith.constant 0 : index
    %17 = vector.load %arg7[%c0_13, %c0_14] : memref<1x128xf32, #tpu.memory_space<vmem>>, vector<1x128xf32>
    %18 = vector.broadcast %17 : vector<1x128xf32> to vector<16x128xf32>
    %19 = arith.addf %16, %18 : vector<16x128xf32>
    %20 = arith.negf %19 : vector<16x128xf32>
    %21 = math.exp %20 : vector<16x128xf32>
    %cst_15 = arith.constant 1.000000e+00 : f32
    %22 = vector.broadcast %cst_15 : f32 to vector<16x128xf32>
    %23 = arith.addf %22, %21 : vector<16x128xf32>
    %24 = arith.divf %22, %23 : vector<16x128xf32>
    %c0_16 = arith.constant 0 : index
    %c0_17 = arith.constant 0 : index
    %25 = vector.load %arg8[%c0_16, %c0_17] : memref<16x128xf32, #tpu.memory_space<vmem>>, vector<16x128xf32>
    tpu.vector_store %arg8[%c0_16, %c0_17], %24 {strides = array<i32>} : memref<16x128xf32, #tpu.memory_space<vmem>>, vector<16x128xf32>,
    return
  }
  func.func @transform_0(%arg0: i32) -> (i32, i32) {
    %c0_i32 = arith.constant 0 : i32
    %c0_i32_0 = arith.constant 0 : i32
    return %arg0, %c0_i32 : i32, i32
  }
  func.func @transform_1(%arg0: i32) -> (i32, i32) {
    %c0_i32 = arith.constant 0 : i32
    %c0_i32_0 = arith.constant 0 : i32
    %c0_i32_1 = arith.constant 0 : i32
    return %c0_i32, %c0_i32_0 : i32, i32
  }
  func.func @transform_2(%arg0: i32) -> (i32, i32) {
    %c0_i32 = arith.constant 0 : i32
    %c0_i32_0 = arith.constant 0 : i32
    %c0_i32_1 = arith.constant 0 : i32
    return %c0_i32, %c0_i32_0 : i32, i32
  }
  func.func @transform_3(%arg0: i32) -> (i32, i32) {
    %c0_i32 = arith.constant 0 : i32
    %c0_i32_0 = arith.constant 0 : i32
    %c0_i32_1 = arith.constant 0 : i32
    return %c0_i32, %c0_i32_0 : i32, i32
  }
  func.func @transform_4(%arg0: i32) -> (i32, i32) {
    %c0_i32 = arith.constant 0 : i32
    %c0_i32_0 = arith.constant 0 : i32
    %c0_i32_1 = arith.constant 0 : i32
    return %c0_i32, %c0_i32_0 : i32, i32
  }
  func.func @transform_5(%arg0: i32) -> (i32, i32) {
    %c0_i32 = arith.constant 0 : i32
    %c0_i32_0 = arith.constant 0 : i32
    %c0_i32_1 = arith.constant 0 : i32
    return %c0_i32, %c0_i32_0 : i32, i32
  }
  func.func @transform_6(%arg0: i32) -> (i32, i32) {
    %c0_i32 = arith.constant 0 : i32
    %c0_i32_0 = arith.constant 0 : i32
    %c0_i32_1 = arith.constant 0 : i32
    return %c0_i32, %c0_i32_0 : i32, i32
  }
  func.func @transform_7(%arg0: i32) -> (i32, i32) {
    %c0_i32 = arith.constant 0 : i32
    %c0_i32_0 = arith.constant 0 : i32
    return %arg0, %c0_i32 : i32, i32
  }
}

</mosaic_0001>

<bundles_post_ra>
// kernel: tpu_custom_call.1
= control target key start
LH: loop header
LB: loop body
LE: loop exit
PB: predicated region body
PF: predicated region fallthrough
CT: control target
= control target key end

     0   :  { %12 = vsyncpa [#allocation3], 0  ;;  %s1201_s0 = inlined_call_operand.hbm [shape: bf16[16,32], index: 0, kind: input, shape index: {}]   ;;  %s1202_s1 = inlined_call_operand.hbm [shape: bf16[32,256], index: 1, kind: input, shape index: {}]   ;;  %s1203_s2 = inlined_call_operand.hbm [shape: f32[1,256], index: 2, kind: input, shape index: {}]   ;;  %s1204_s3 = inlined_call_operand.hbm [shape: bf16[256,256], index: 3, kind: input, shape index: {}]   ;;  %s1205_s4 = inlined_call_operand.vmem [shape: f32[1,256], index: 4, kind: input, shape index: {}]   ;;  %s1206_s5 = inlined_call_operand.hbm [shape: bf16[256,128], index: 5, kind: input, shape index: {}]   ;;  %s1207_s6 = inlined_call_operand.vmem [shape: f32[1,128], index: 6, kind: input, shape index: {}]   ;;  %s1208_s7 = inlined_call_operand.hbm [shape: f32[16,128], index: 7, kind: output, shape index: {}]  }
   0x1   :  { %13 = vsyncpa [#allocation6], 0 }
   0x2   :  { %14 = vsyncpa [#allocation9], 0  ;;  %s33_s26 = sshll.u32 %s1202_s1, 4  ;;  %s34_s26 = int_to_ptr.hbm [resolvable:$true] %s33_s26 }
   0x3   :  { %15 = vsyncpa [#allocation4], 0  ;;  %s1116_s27 = smov [#allocation5]   ;;  %s57_s8 = sshll.u32 %s1204_s3, 4  ;;  %s58_s8 = int_to_ptr.hbm [resolvable:$true] %s57_s8 }
   0x4   :  { %s35_s28 = sshll.u32 %s1116_s27, 4  ;;  %s1117_s9 = smov 128   ;;  %s36_s28 = int_to_ptr.vmem [resolvable:$true] %s35_s28 }
   0x5   :  { %s1118_s10 = smov 8   ;;  %s1119_s11 = smov [#allocation8]  }
   0x6   :  { %41 = dma.hbm_to_vmem [thread:$0]  %s34_s26, 512, %s36_s28, [#allocation6], %s1117_s9, %s1117_s9, %s1118_s10  }
   0x7   :  { %s59_s12 = sshll.u32 %s1119_s11, 4  ;;  %s20_s14 = sshll.u32 %s1201_s0, 4  ;;  %s60_s12 = int_to_ptr.vmem [resolvable:$true] %s59_s12  ;;  %s21_s14 = int_to_ptr.hbm [resolvable:$true] %s20_s14 }
   0x8   :  { %65 = dma.hbm_to_vmem [thread:$0]  %s58_s8, 4096, %s60_s12, [#allocation9], %s1117_s9, %s1117_s9, %s1118_s10  }
   0x9   :  { %s1120_s3 = smov [#allocation2]   ;;  %s47_s18 = sshll.u32 %s1203_s2, 4  ;;  %s48_s18 = int_to_ptr.hbm [resolvable:$true] %s47_s18 }
   0xa   :  { %s22_s15 = sshll.u32 %s1120_s3, 4  ;;  %s1121_s19 = smov 64   ;;  %s23_s15 = int_to_ptr.vmem [resolvable:$true] %s22_s15 }
   0xb   :  { %s1122_s20 = smov 4   ;;  %s1123_s21 = smov [#allocation7]  }
   0xc   :  { %28 = dma.hbm_to_vmem [thread:$0]  %s21_s14, 128, %s23_s15, [#allocation3], %s1121_s19, %s1121_s19, %s1122_s20  }
   0xd   :  { %s49_s22 = sshll.u32 %s1123_s21, 4  ;;  %s72_s24 = sshll.u32 %s1206_s5, 4  ;;  %s50_s22 = int_to_ptr.vmem [resolvable:$true] %s49_s22  ;;  %s73_s24 = int_to_ptr.hbm [resolvable:$true] %s72_s24 }
   0xe   :  { %52 = dma.hbm_to_vmem [thread:$0]  %s48_s18, 32, %s50_s22, [#allocation6]  }
   0xf   :  { %s1124_s25 = smov [#allocation10]  }
  0x10   :  { %s74_s26 = sshll.u32 %s1124_s25, 4  ;;  %s75_s26 = int_to_ptr.vmem [resolvable:$true] %s74_s26 }
  0x11   :  { %80 = dma.hbm_to_vmem [thread:$0]  %s73_s24, 2048, %s75_s26, [#allocation9], %s1121_s19, %s1121_s19, %s1122_s20  }
  0x12   :  { %1108 = dma.done.wait [#allocation3], 128  }
  0x13   :  { %1109 = vsyncadd [#allocation3], 4294967168 }
  0x14   :  { %1110 = dma.done.wait [#allocation6], 544  }
  0x15   :  { %1111 = vsyncadd [#allocation6], 4294966752 }
  0x16   :  { %1112 = dma.done.wait [#allocation9], 6144  }
  0x17   :  { %1113 = vsyncadd [#allocation9], 4294961152  ;;  %v674_v0 = vld [vmem:[#allocation5 + $0x10] sm:$0xf]  ;;  %v880_v1 = vld [vmem:[#allocation5 + $0x14] sm:$0xf0] }
  0x18   :  { %v879_v2 = vld [vmem:[#allocation5 + $0x14] sm:$0xf]  ;;  %v675_v3 = vor.u32 %v880_v1, %v674_v0  ;;  %v676_v4 = vld [vmem:[#allocation5 + $0x18] sm:$0xf0]  ;;  %v666_v5 = vld [vmem:[#allocation5] sm:$0xf] }
  0x19   :  { %v878_v6 = vld [vmem:[#allocation5 + $0x4] sm:$0xf0]  ;;  %v679_v7 = vor.u32 %v879_v2, %v676_v4  ;;  %v877_v8 = vld [vmem:[#allocation5 + $0x4] sm:$0xf]  ;;  %v668_v9 = vld [vmem:[#allocation5 + $0x8] sm:$0xf0] }
  0x1a   :  { %vm141_vm0 = vcmask 261120   ;;  %151 = vmatpush.bf16.msra.mxu0 %v675_v3  ;;  %v667_v10 = vor.u32 %v878_v6, %v666_v5  ;;  %v740_v11 = vld [vmem:[#allocation8 + $0x70] sm:$0xf]  ;;  %v896_v12 = vld [vmem:[#allocation8 + $0x74] sm:$0xf0]  ;;  %v671_v14 = vor.u32 %v877_v8, %v668_v9  ;;  %s645_s8 = sshll.u32 %s1208_s7, 4  ;;  %s646_s8 = int_to_ptr.hbm [resolvable:$true] %s645_s8 }
  0x1b   :  { %v804_v13 = vld [vmem:[#allocation8 + $0xf0] sm:$0xf]  ;;  %165 = vmatpush.bf16.msra.mxu1 %v679_v7  ;;  %v876_v15 = vld [vmem:[#allocation2] sm:$0xff]  ;;  %v741_v16 = vor.u32 %v896_v12, %v740_v11  ;;  %v732_v24 = vld [vmem:[#allocation8 + $0x60] sm:$0xf] }
  0x1c   :  { %v912_v17 = vld [vmem:[#allocation8 + $0xf4] sm:$0xf0]  ;;  %v895_v18 = vld [vmem:[#allocation8 + $0x74] sm:$0xf]  ;;  %v742_v19 = vld [vmem:[#allocation8 + $0x78] sm:$0xf0] }
  0x1d   :  { %v805_v20 = vor.u32 %v912_v17, %v804_v13  ;;  %v745_v21 = vor.u32 %v895_v18, %v742_v19  ;;  %v911_v22 = vld [vmem:[#allocation8 + $0xf4] sm:$0xf]  ;;  %v806_v23 = vld [vmem:[#allocation8 + $0xf8] sm:$0xf0]  ;;  %377 = vmatpush.bf16.msra.mxu2 %v741_v16  ;;  %v894_v26 = vld [vmem:[#allocation8 + $0x64] sm:$0xf0] }
  0x1e   :  { %v809_v25 = vor.u32 %v911_v22, %v806_v23  ;;  %v796_v27 = vld [vmem:[#allocation8 + $0xe0] sm:$0xf]  ;;  %v910_v28 = vld [vmem:[#allocation8 + $0xe4] sm:$0xf0]  ;;  %152 = vmatpush.bf16.msra.mxu0 %v667_v10  ;;  %v733_v29 = vor.u32 %v894_v26, %v732_v24  ;;  %v893_v31 = vld [vmem:[#allocation8 + $0x64] sm:$0xf] }
  0x1f   :  { %391 = vmatpush.bf16.msra.mxu3 %v805_v20  ;;  %v797_v30 = vor.u32 %v910_v28, %v796_v27  ;;  %v734_v32 = vld [vmem:[#allocation8 + $0x68] sm:$0xf0]  ;;  %v909_v33 = vld [vmem:[#allocation8 + $0xe4] sm:$0xf]  ;;  %166 = vmatpush.bf16.msra.mxu1 %v671_v14  ;;  %v724_v36 = vld [vmem:[#allocation8 + $0x50] sm:$0xf] }
  0x20   :  { %v737_v34 = vor.u32 %v893_v31, %v734_v32  ;;  %v798_v35 = vld [vmem:[#allocation8 + $0xe8] sm:$0xf0]  ;;  %v892_v37 = vld [vmem:[#allocation8 + $0x54] sm:$0xf0]  ;;  %v788_v39 = vld [vmem:[#allocation8 + $0xd0] sm:$0xf] }
  0x21   :  { %v801_v38 = vor.u32 %v909_v33, %v798_v35  ;;  %v908_v40 = vld [vmem:[#allocation8 + $0xd4] sm:$0xf0]  ;;  %v891_v41 = vld [vmem:[#allocation8 + $0x54] sm:$0xf]  ;;  %680 = vmatmul.msk.bf16.vlgmr.msra.gmra.mxu0 %vm141_vm0, %v876_v15  ;;  %378 = vmatpush.bf16.msra.mxu2 %v733_v29  ;;  %v725_v42 = vor.u32 %v892_v37, %v724_v36  ;;  %v726_v43 = vld [vmem:[#allocation8 + $0x58] sm:$0xf0] }
  0x22   :  { %405 = vmatpush.bf16.msrb.mxu0 %v745_v21  ;;  %v907_v44 = vld [vmem:[#allocation8 + $0xd4] sm:$0xf]  ;;  %v790_v45 = vld [vmem:[#allocation8 + $0xd8] sm:$0xf0]  ;;  %681 = vmatmul.msk.bf16.vlgmr.msra.gmra.mxu1 %vm141_vm0, %v876_v15  ;;  %v789_v46 = vor.u32 %v908_v40, %v788_v39  ;;  %v729_v47 = vor.u32 %v891_v41, %v726_v43  ;;  %v716_v49 = vld [vmem:[#allocation8 + $0x40] sm:$0xf] }
  0x23   :  { %419 = vmatpush.bf16.msrb.mxu1 %v809_v25  ;;  %392 = vmatpush.bf16.msra.mxu3 %v797_v30  ;;  %v793_v48 = vor.u32 %v907_v44, %v790_v45  ;;  %v890_v50 = vld [vmem:[#allocation8 + $0x44] sm:$0xf0]  ;;  %v780_v51 = vld [vmem:[#allocation8 + $0xc0] sm:$0xf]  ;;  %v889_v54 = vld [vmem:[#allocation8 + $0x44] sm:$0xf] }
  0x24   :  { %v717_v52 = vor.u32 %v890_v50, %v716_v49  ;;  %v906_v53 = vld [vmem:[#allocation8 + $0xc4] sm:$0xf0]  ;;  %v718_v55 = vld [vmem:[#allocation8 + $0x48] sm:$0xf0]  ;;  %v905_v58 = vld [vmem:[#allocation8 + $0xc4] sm:$0xf] }
  0x25   :  { %379 = vmatpush.bf16.msra.mxu2 %v725_v42  ;;  %v781_v56 = vor.u32 %v906_v53, %v780_v51  ;;  %v721_v57 = vor.u32 %v889_v54, %v718_v55  ;;  %v782_v59 = vld [vmem:[#allocation8 + $0xc8] sm:$0xf0]  ;;  %v708_v61 = vld [vmem:[#allocation8 + $0x30] sm:$0xf]  ;;  %v888_v62 = vld [vmem:[#allocation8 + $0x34] sm:$0xf0] }
  0x26   :  { %406 = vmatpush.bf16.msrb.mxu0 %v737_v34  ;;  %v785_v60 = vor.u32 %v905_v58, %v782_v59  ;;  %v772_v63 = vld [vmem:[#allocation8 + $0xb0] sm:$0xf]  ;;  %v709_v0 = vor.u32 %v888_v62, %v708_v61  ;;  %v904_v1 = vld [vmem:[#allocation8 + $0xb4] sm:$0xf0]  ;;  %v887_v2 = vld [vmem:[#allocation8 + $0x34] sm:$0xf] }
  0x27   :  { %420 = vmatpush.bf16.msrb.mxu1 %v801_v38  ;;  %393 = vmatpush.bf16.msra.mxu3 %v789_v46  ;;  %v710_v3 = vld [vmem:[#allocation8 + $0x38] sm:$0xf0]  ;;  %v773_v4 = vor.u32 %v904_v1, %v772_v63  ;;  %v903_v6 = vld [vmem:[#allocation8 + $0xb4] sm:$0xf]  ;;  %v700_v9 = vld [vmem:[#allocation8 + $0x20] sm:$0xf] }
  0x28   :  { %v713_v5 = vor.u32 %v887_v2, %v710_v3  ;;  %v774_v7 = vld [vmem:[#allocation8 + $0xb8] sm:$0xf0]  ;;  %v886_v10 = vld [vmem:[#allocation8 + $0x24] sm:$0xf0]  ;;  %v764_v11 = vld [vmem:[#allocation8 + $0xa0] sm:$0xf] }
  0x29   :  { %380 = vmatpush.bf16.msra.mxu2 %v717_v52  ;;  %v777_v8 = vor.u32 %v903_v6, %v774_v7  ;;  %v701_v12 = vor.u32 %v886_v10, %v700_v9  ;;  %v902_v13 = vld [vmem:[#allocation8 + $0xa4] sm:$0xf0]  ;;  %v885_v14 = vld [vmem:[#allocation8 + $0x24] sm:$0xf]  ;;  %v702_v15 = vld [vmem:[#allocation8 + $0x28] sm:$0xf0] }
  0x2a   :  { %407 = vmatpush.bf16.msrb.mxu0 %v729_v47  ;;  %v765_v16 = vor.u32 %v902_v13, %v764_v11  ;;  %v705_v17 = vor.u32 %v885_v14, %v702_v15  ;;  %v901_v18 = vld [vmem:[#allocation8 + $0xa4] sm:$0xf]  ;;  %v766_v19 = vld [vmem:[#allocation8 + $0xa8] sm:$0xf0]  ;;  %v692_v21 = vld [vmem:[#allocation8 + $0x10] sm:$0xf] }
  0x2b   :  { %421 = vmatpush.bf16.msrb.mxu1 %v793_v48  ;;  %394 = vmatpush.bf16.msra.mxu3 %v781_v56  ;;  %v769_v20 = vor.u32 %v901_v18, %v766_v19  ;;  %v884_v22 = vld [vmem:[#allocation8 + $0x14] sm:$0xf0]  ;;  %v756_v23 = vld [vmem:[#allocation8 + $0x90] sm:$0xf]  ;;  %v883_v26 = vld [vmem:[#allocation8 + $0x14] sm:$0xf] }
  0x2c   :  { %v693_v24 = vor.u32 %v884_v22, %v692_v21  ;;  %v900_v25 = vld [vmem:[#allocation8 + $0x94] sm:$0xf0]  ;;  %v694_v27 = vld [vmem:[#allocation8 + $0x18] sm:$0xf0]  ;;  %v899_v30 = vld [vmem:[#allocation8 + $0x94] sm:$0xf] }
  0x2d   :  { %381 = vmatpush.bf16.msra.mxu2 %v709_v0  ;;  %v757_v28 = vor.u32 %v900_v25, %v756_v23  ;;  %v697_v29 = vor.u32 %v883_v26, %v694_v27  ;;  %v758_v31 = vld [vmem:[#allocation8 + $0x98] sm:$0xf0]  ;;  %v684_v32 = vld [vmem:[#allocation8] sm:$0xf]  ;;  %v882_v34 = vld [vmem:[#allocation8 + $0x4] sm:$0xf0] }
  0x2e   :  { %408 = vmatpush.bf16.msrb.mxu0 %v721_v57  ;;  %v761_v33 = vor.u32 %v899_v30, %v758_v31  ;;  %v748_v35 = vld [vmem:[#allocation8 + $0x80] sm:$0xf]  ;;  %v898_v36 = vld [vmem:[#allocation8 + $0x84] sm:$0xf0]  ;;  %v685_v37 = vor.u32 %v882_v34, %v684_v32  ;;  %v881_v39 = vld [vmem:[#allocation8 + $0x4] sm:$0xf] }
  0x2f   :  { %422 = vmatpush.bf16.msrb.mxu1 %v785_v60  ;;  %395 = vmatpush.bf16.msra.mxu3 %v773_v4  ;;  %v749_v38 = vor.u32 %v898_v36, %v748_v35  ;;  %v686_v40 = vld [vmem:[#allocation8 + $0x8] sm:$0xf0]  ;;  %v897_v41 = vld [vmem:[#allocation8 + $0x84] sm:$0xf]  ;;  %v928_v45 = vld [vmem:[#allocation10 + $0x78] sm:$0xff] }
  0x30   :  { %v689_v42 = vor.u32 %v881_v39, %v686_v40  ;;  %v750_v43 = vld [vmem:[#allocation8 + $0x88] sm:$0xf0]  ;;  %v920_v46 = vld [vmem:[#allocation10 + $0x38] sm:$0xff]  ;;  %v927_v47 = vld [vmem:[#allocation10 + $0x70] sm:$0xff] }
  0x31   :  { %382 = vmatpush.bf16.msra.mxu2 %v701_v12  ;;  %v753_v44 = vor.u32 %v897_v41, %v750_v43  ;;  %v926_v48 = vld [vmem:[#allocation10 + $0x68] sm:$0xff]  ;;  %v110_v49 = vld [vmem:[#allocation7] sm:$0x3]  ;;  %v919_v2 = vld [vmem:[#allocation10 + $0x30] sm:$0xff] }
  0x32   :  { %409 = vmatpush.bf16.msrb.mxu0 %v713_v5  ;;  %v112_v51 = vperm.slane %v110_v49, 0  ;;  %v113_v53 = vperm.slane %v110_v49, 1  ;;  %v925_v3 = vld [vmem:[#allocation10 + $0x60] sm:$0xff]  ;;  %v918_v4 = vld [vmem:[#allocation10 + $0x28] sm:$0xff]  ;;  %v924_v5 = vld [vmem:[#allocation10 + $0x58] sm:$0xff] }
  0x33   :  { %423 = vmatpush.bf16.msrb.mxu1 %v777_v8  ;;  %396 = vmatpush.bf16.msra.mxu3 %v765_v16  ;;  %v917_v6 = vld [vmem:[#allocation10 + $0x20] sm:$0xff]  ;;  %v923_v7 = vld [vmem:[#allocation10 + $0x50] sm:$0xff]  ;;  %v916_v8 = vld [vmem:[#allocation10 + $0x18] sm:$0xff] }
  0x34   :  { %v922_v9 = vld [vmem:[#allocation10 + $0x48] sm:$0xff]  ;;  %v915_v10 = vld [vmem:[#allocation10 + $0x10] sm:$0xff]  ;;  %v921_v11 = vld [vmem:[#allocation10 + $0x40] sm:$0xff] }
  0x35   :  { %383 = vmatpush.bf16.msra.mxu2 %v693_v24  ;;  %v914_v12 = vld [vmem:[#allocation10 + $0x8] sm:$0xff]  ;;  %v913_v13 = vld [vmem:[#allocation10] sm:$0xff]  ;;  %v211_v14 = vld [vmem:[%s1205_s4] sm:$0x3] }
  0x36   :  { %410 = vmatpush.bf16.msrb.mxu0 %v705_v17  ;;  %v214_v15 = vperm.slane %v211_v14, 1  ;;  %v213_v19 = vperm.slane %v211_v14, 0  ;;  %v939_v39 = vld [vmem:[%s1207_s6] ss:$0 sm:$0xff]  ;;  %s1125_s6 = smov [#allocation11]  }
  0x37   :  { %424 = vmatpush.bf16.msrb.mxu1 %v769_v20  ;;  %397 = vmatpush.bf16.msra.mxu3 %v757_v28  ;;  %s643_s28 = sshll.u32 %s1125_s6, 4  ;;  %s644_s28 = int_to_ptr.vmem [resolvable:$true] %s643_s28 }
  0x39   :  { %384 = vmatpush.bf16.msra.mxu2 %v685_v37 }
  0x3a   :  { %411 = vmatpush.bf16.msrb.mxu0 %v697_v29 }
  0x3b   :  { %425 = vmatpush.bf16.msrb.mxu1 %v761_v33  ;;  %398 = vmatpush.bf16.msra.mxu3 %v749_v38 }
  0x3d   :  { %571 = vmatpush.bf16.msrb.mxu2 %v920_v46 }
  0x3e   :  { %412 = vmatpush.bf16.msrb.mxu0 %v689_v42 }
  0x3f   :  { %426 = vmatpush.bf16.msrb.mxu1 %v753_v44  ;;  %585 = vmatpush.bf16.msrb.mxu3 %v928_v45 }
  0x41   :  { %572 = vmatpush.bf16.msrb.mxu2 %v919_v2 }
  0x43   :  { %586 = vmatpush.bf16.msrb.mxu3 %v927_v47 }
  0x45   :  { %573 = vmatpush.bf16.msrb.mxu2 %v918_v4 }
  0x47   :  { %587 = vmatpush.bf16.msrb.mxu3 %v926_v48 }
  0x49   :  { %574 = vmatpush.bf16.msrb.mxu2 %v917_v6 }
  0x4b   :  { %588 = vmatpush.bf16.msrb.mxu3 %v925_v3 }
  0x4d   :  { %575 = vmatpush.bf16.msrb.mxu2 %v916_v8 }
  0x4f   :  { %589 = vmatpush.bf16.msrb.mxu3 %v924_v5 }
  0x51   :  { %576 = vmatpush.bf16.msrb.mxu2 %v915_v10 }
  0x53   :  { %590 = vmatpush.bf16.msrb.mxu3 %v923_v7 }
  0x55   :  { %577 = vmatpush.bf16.msrb.mxu2 %v914_v12 }
  0x57   :  { %591 = vmatpush.bf16.msrb.mxu3 %v922_v9 }
  0x59   :  { %578 = vmatpush.bf16.msrb.mxu2 %v913_v13 }
  0x5b   :  { %592 = vmatpush.bf16.msrb.mxu3 %v921_v11 }
  0x9e   :  { %v154_v50 = vpop.f32.mrf.mxu0 }
  0x9f   :  { %v168_v52 = vpop.f32.mrf.mxu1  ;;  %v155_v54 = vadd.f32 %v154_v50, %v112_v51 }
  0xa0   :  { %v169_v55 = vadd.f32 %v168_v52, %v113_v53 }
  0xa1   :  { %940 = vtanh.f32 %v155_v54 }
  0xa2   :  { %942 = vtanh.f32 %v169_v55 }
  0xa6   :  { %v156_v56 = vpop.f32.mrf.mxu0 }
  0xa7   :  { %v157_v57 = vadd.f32 %v156_v56, %v112_v51  ;;  %v170_v58 = vpop.f32.mrf.mxu1  ;;  %v941_v60 = vpop.eup %940 }
  0xa8   :  { %v171_v59 = vadd.f32 %v170_v58, %v113_v53  ;;  %v943_v61 = vpop.eup %942 }
  0xa9   :  { %944 = vtanh.f32 %v157_v57 }
  0xaa   :  { %946 = vtanh.f32 %v171_v59 }
  0xaf   :  { %v945_v62 = vpop.eup %944 }
  0xb0   :  { %v947_v63 = vpop.eup %946  ;;  %v177_v0 = vpack.c.bf16 %v945_v62, %v941_v60 }
  0xb1   :  { %v178_v1 = vpack.c.bf16 %v947_v63, %v943_v61 }
  0xb2   :  { %385 = vmatmul.bf16.vlgmr.msra.gmra.mxu2 %v177_v0  ;;  %413 = vmatmul.bf16.vlgmr.msrb.gmra.mxu0 %v177_v0 }
  0xb3   :  { %399 = vmatmul.bf16.vlgmr.msra.gmra.mxu3 %v178_v1  ;;  %427 = vmatmul.bf16.vlgmr.msrb.gmra.mxu1 %v178_v1 }
 0x12f   :  { %v414_v16 = vpop.f32.mrf.mxu0 }
 0x130   :  { %v428_v17 = vpop.f32.mrf.mxu1  ;;  %v415_v18 = vadd.f32 %v414_v16, %v214_v15 }
 0x132   :  { %v429_v22 = vadd.f32 %v428_v17, %v415_v18 }
 0x134   :  { %948 = vtanh.f32 %v429_v22 }
 0x135   :  { %v386_v20 = vpop.f32.mrf.mxu2 }
 0x136   :  { %v400_v21 = vpop.f32.mrf.mxu3  ;;  %v387_v25 = vadd.f32 %v386_v20, %v213_v19 }
 0x137   :  { %v416_v23 = vpop.f32.mrf.mxu0 }
 0x138   :  { %v417_v24 = vadd.f32 %v416_v23, %v214_v15  ;;  %v430_v26 = vpop.f32.mrf.mxu1  ;;  %v401_v28 = vadd.f32 %v400_v21, %v387_v25 }
 0x13a   :  { %v431_v27 = vadd.f32 %v430_v26, %v417_v24  ;;  %v949_v33 = vpop.eup %948 }
 0x13c   :  { %950 = vtanh.f32 %v431_v27 }
 0x13d   :  { %v388_v29 = vpop.f32.mrf.mxu2  ;;  %952 = vtanh.f32 %v401_v28 }
 0x13e   :  { %v389_v30 = vadd.f32 %v388_v29, %v213_v19  ;;  %v402_v31 = vpop.f32.mrf.mxu3 }
 0x140   :  { %v403_v32 = vadd.f32 %v402_v31, %v389_v30 }
 0x142   :  { %v951_v34 = vpop.eup %950  ;;  %954 = vtanh.f32 %v403_v32 }
 0x143   :  { %v438_v35 = vpack.c.bf16 %v951_v34, %v949_v33  ;;  %v953_v36 = vpop.eup %952 }
 0x145   :  { %593 = vmatmul.bf16.vlgmr.msrb.gmra.mxu3 %v438_v35 }
 0x148   :  { %v955_v37 = vpop.eup %954 }
 0x149   :  { %v437_v38 = vpack.c.bf16 %v955_v37, %v953_v36 }
 0x14b   :  { %579 = vmatmul.bf16.vlgmr.msrb.gmra.mxu2 %v437_v38 }
 0x1c8   :  { %v594_v40 = vpop.f32.mrf.mxu3 }
 0x1ce   :  { %v580_v41 = vpop.f32.mrf.mxu2 }
 0x1cf   :  { %v581_v42 = vadd.f32 %v939_v39, %v580_v41 }
 0x1d0   :  { %v596_v47 = vpop.f32.mrf.mxu3 }
 0x1d1   :  { %v595_v43 = vadd.f32 %v594_v40, %v581_v42 }
 0x1d3   :  { %v874_v44 = vmul.f32 -1.442695, %v595_v43 }
 0x1d5   :  { %956 = vpow2.f32 %v874_v44 }
 0x1d6   :  { %v582_v45 = vpop.f32.mrf.mxu2 }
 0x1d7   :  { %v583_v46 = vadd.f32 %v939_v39, %v582_v45 }
 0x1d9   :  { %v597_v48 = vadd.f32 %v596_v47, %v583_v46 }
 0x1db   :  { %v957_v49 = vpop.eup %956  ;;  %v875_v50 = vmul.f32 -1.442695, %v597_v48 }
 0x1dc   :  { %v605_v51 = vadd.f32 1.0, %v957_v49 }
 0x1dd   :  { %958 = vpow2.f32 %v875_v50 }
 0x1de   :  { %960 = vrcp.f32 %v605_v51  ;;  %v618_v57 = vand.u32 2147483648, %v605_v51  ;;  %v616_v59 = vand.u32 2147483647, %v605_v51  ;;  %vm612_vm2 = vweird.f32 %v605_v51 }
 0x1e0   :  { %v619_v62 = vor.u32 1.1754944e-38, %v618_v57  ;;  %vm617_vm4 = vcmp.eq.f32.partialorder %v616_v59, 8.507059e+37 }
 0x1e3   :  { %v959_v52 = vpop.eup %958 }
 0x1e4   :  { %v961_v53 = vpop.eup %960  ;;  %v606_v54 = vadd.f32 1.0, %v959_v52 }
 0x1e5   :  { %v608_v55 = vmul.f32 %v961_v53, %v605_v51  ;;  %vm613_vm1 = vweird.f32 %v961_v53 }
 0x1e6   :  { %962 = vrcp.f32 %v606_v54  ;;  %vm614_vm3 = vmor %vm612_vm2, %vm613_vm1  ;;  %v633_v3 = vand.u32 2147483648, %v606_v54  ;;  %v631_v5 = vand.u32 2147483647, %v606_v54  ;;  %vm627_vm6 = vweird.f32 %v606_v54 }
 0x1e7   :  { %v609_v56 = vsub.f32 1.0, %v608_v55 }
 0x1e8   :  { %v634_v7 = vor.u32 1.1754944e-38, %v633_v3  ;;  %vm632_vm8 = vcmp.eq.f32.partialorder %v631_v5, 8.507059e+37 }
 0x1e9   :  { %v610_v58 = vmul.f32 %v961_v53, %v609_v56 }
 0x1eb   :  { %v611_v60 = vadd.f32 %v961_v53, %v610_v58 }
 0x1ec   :  { %v963_v61 = vpop.eup %962 }
 0x1ed   :  { %v623_v63 = vmul.f32 %v963_v61, %v606_v54  ;;  %v615_v0 = vsel %vm614_vm3, %v961_v53, %v611_v60  ;;  %vm628_vm5 = vweird.f32 %v963_v61 }
 0x1ee   :  { %v620_v1 = vsel %vm617_vm4, %v619_v62, %v615_v0  ;;  %vm629_vm7 = vmor %vm627_vm6, %vm628_vm5 }
 0x1ef   :  { %v624_v2 = vsub.f32 1.0, %v623_v63  ;;  %637 = vst [vmem:[#allocation11] sm:$0xff] %v620_v1 }
 0x1f1   :  { %v625_v4 = vmul.f32 %v963_v61, %v624_v2 }
 0x1f3   :  { %v626_v6 = vadd.f32 %v963_v61, %v625_v4 }
 0x1f5   :  { %v630_v8 = vsel %vm629_vm7, %v963_v61, %v626_v6 }
 0x1f6   :  { %v635_v9 = vsel %vm632_vm8, %v634_v7, %v630_v8 }
 0x1f7   :  { %638 = vst [vmem:[#allocation11 + $0x8] sm:$0xff] %v635_v9 }
 0x1f8   :  { %651 = dma.vmem_to_hbm [thread:$0]  %s644_s28, 256, %s646_s8, [#allocation4], %s1117_s9, %s1117_s9, %s1118_s10  }
 0x1f9   :  { %1114 = dma.done.wait [#allocation4], 256  }
 0x1fa   :  { %1115 = vsyncadd [#allocation4], 4294967040 }
 0x1fb   :  { %656 = vsyncpa [#allocation3], 1 }
 0x1fc   :  { %657 = vsyncpa [#allocation6], 1 }
 0x1fd   :  { %658 = vsyncpa [#allocation9], 1 }
 0x1fe   :  { %659 = vsyncpa [#allocation4], 1 }

</bundles_post_ra>
